<compile_context>
chip_gen: v7x
topology: tpu7x:2x2x1
jax: 0.10.0
libtpu: 0.0.40
codegen_flags: <defaults>
</compile_context>

<pallas_src>
import functools
import math

import jax
import jax.numpy as jnp
from jax import lax
from jax.experimental import pallas as pl
from jax.experimental.pallas import tpu as pltpu


def _sigmoid(x):
    # sigmoid(x) == 0.5 * (tanh(x / 2) + 1): a single EUP tanh instead of a VPU divide.
    return 0.5 * jnp.tanh(0.5 * x) + 0.5


# ----------------------------------------------------------------------------
# Fused kernel: time-MLP + hoisted input projection + LSTM recurrence
#               + RMSNorm(ht, ct) + FiLM modulation.
# ----------------------------------------------------------------------------
def encoder_rnn_block_kernel(
    x_ref,      # (T*B, C_in)    time-major flattened input
    wih_ref,    # (C_in, 4H)     gate columns ordered [i, f, o, g]
    whh_ref,    # (H,   4H)      gate columns ordered [i, f, o, g]
    b_ref,      # (1,   4H)      b_ih + b_hh, ordered [i, f, o, g]
    te_ref,     # (B, time_dim)  raw time embedding
    wtm_ref,    # (time_dim, 2H) time-MLP Linear weight (transposed)
    btm_ref,    # (1, 2H)        time-MLP Linear bias
    gh_ref,     # (1, H)         RMSNorm weight for ht
    gc_ref,     # (1, H)         RMSNorm weight for ct
    ht_ref,     # (B, H)         output: modulated final hidden state
    ct_ref,     # (B, H)         output: modulated final cell state
    *, B, T, H,
):
    f32 = jnp.float32

    # ---- time MLP (fused in): SiLU -> Linear(time_dim, 2H) -> FiLM scale/shift ----
    te = te_ref[...]
    silu = te * _sigmoid(te)
    film = jnp.dot(silu, wtm_ref[...], preferred_element_type=f32) + btm_ref[...]
    scale = film[:, :H] + 1.0           # (B, H)
    shift = film[:, H:]                 # (B, H)

    # ---- hoisted input projection: ONE MXU matmul for all timesteps ----
    gx = jnp.dot(x_ref[...], wih_ref[...], preferred_element_type=f32) + b_ref[...]  # (T*B, 4H)

    w_hh = whh_ref[...]

    h = jnp.zeros((B, H), f32)
    c = jnp.zeros((B, H), f32)
    H3 = 3 * H

    # ---- serial LSTM recurrence, fully unrolled (T is tiny & static) ----
    for t in range(T):
        gates = gx[t * B:(t + 1) * B, :] + jnp.dot(
            h, w_hh, preferred_element_type=f32)          # (B, 4H), [i | f | o | g]
        sig = _sigmoid(gates[:, :H3])                     # i, f, o in one wide pass
        g_g = jnp.tanh(gates[:, H3:])
        i_g = sig[:, :H]
        f_g = sig[:, H:2 * H]
        o_g = sig[:, 2 * H:]
        c = f_g * c + i_g * g_g
        h = o_g * jnp.tanh(c)

    # ---- RMSNorm over H (== F.normalize(dim=feature) * g * sqrt(H)), fused with FiLM ----
    sqrt_h = math.sqrt(H)
    eps2 = 1e-24   # matches F.normalize's max(||x||, 1e-12) clamp

    def _norm_film(v, g):
        # (v * inv_norm * sqrt_h * g) * scale + shift, with the per-feature factors
        # folded into a single multiplier before touching v.
        inv = lax.rsqrt(jnp.maximum(jnp.sum(v * v, axis=-1, keepdims=True), eps2))  # (B, 1)
        return v * (inv * (sqrt_h * g) * scale) + shift

    ht_ref[...] = _norm_film(h, gh_ref[...])
    ct_ref[...] = _norm_film(c, gc_ref[...])


# ----------------------------------------------------------------------------
# Wrapper
# ----------------------------------------------------------------------------
def _reorder_gates_ifgo_to_ifog(m):
    """Permute PyTorch LSTM gate row-blocks [i, f, g, o] -> kernel order [i, f, o, g]."""
    i, f, g, o = jnp.split(m, 4, axis=0)
    return jnp.concatenate([i, f, o, g], axis=0)


@jax.jit
def encoder_rnn_block_forward(x_bct, time_embed, params):
    """x_bct: (B, C_in, T), time_embed: (B, time_dim). Returns (ht, ct), each (1, B, H)."""
    B, C_in, T = x_bct.shape
    H = params["w_hh"].shape[1]

    # One-time parameter prep (in production this is hoisted to weight-load time).
    w_ih_k = _reorder_gates_ifgo_to_ifog(params["w_ih"]).T                 # (C_in, 4H)
    w_hh_k = _reorder_gates_ifgo_to_ifog(params["w_hh"]).T                 # (H, 4H)
    b_k = _reorder_gates_ifgo_to_ifog(
        (params["b_ih"] + params["b_hh"])[:, None]).T                      # (1, 4H)
    w_tm_k = params["w_tm"].T                                              # (time_dim, 2H)
    b_tm_k = params["b_tm"][None, :]                                       # (1, 2H)
    g_h = params["g_h"][0, :, 0][None, :]                                  # (1, H)
    g_c = params["g_c"][0, :, 0][None, :]                                  # (1, H)

    # Time-major flattened input feeding the hoisted (T*B, C_in) @ (C_in, 4H) matmul.
    x_tm = jnp.transpose(x_bct, (2, 0, 1)).reshape(T * B, C_in).astype(jnp.float32)

    kernel = functools.partial(encoder_rnn_block_kernel, B=B, T=T, H=H)
    ht, ct = pl.pallas_call(
        kernel,
        out_shape=(jax.ShapeDtypeStruct((B, H), jnp.float32),
                   jax.ShapeDtypeStruct((B, H), jnp.float32)),
        in_specs=[pl.BlockSpec(memory_space=pltpu.MemorySpace.VMEM)] * 9,
        out_specs=(pl.BlockSpec(memory_space=pltpu.MemorySpace.VMEM),
                   pl.BlockSpec(memory_space=pltpu.MemorySpace.VMEM)),
    )(x_tm, w_ih_k, w_hh_k, b_k,
      time_embed.astype(jnp.float32), w_tm_k, b_tm_k, g_h, g_c)

    # PyTorch returns (num_layers * num_directions, B, H) == (1, B, H).
    return ht[None], ct[None]


# ----------------------------------------------------------------------------
# Pure-JAX reference (mirrors the PyTorch forward, PyTorch weight layout).
# ----------------------------------------------------------------------------
def encoder_rnn_block_ref(x_bct, time_embed, params):
    H = params["w_hh"].shape[1]
    silu = time_embed * jax.nn.sigmoid(time_embed)
    film = silu @ params["w_tm"].T + params["b_tm"]
    scale, shift = film[:, :H], film[:, H:]

    x_tbc = jnp.transpose(x_bct, (2, 0, 1))                 # (T, B, C_in)
    B = x_tbc.shape[1]
    w_ih_t = params["w_ih"].T
    w_hh_t = params["w_hh"].T
    b = params["b_ih"] + params["b_hh"]

    def step(carry, x_t):
        h, c = carry
        gates = x_t @ w_ih_t + h @ w_hh_t + b
        i, f, g, o = jnp.split(gates, 4, axis=-1)
        c = jax.nn.sigmoid(f) * c + jax.nn.sigmoid(i) * jnp.tanh(g)
        h = jax.nn.sigmoid(o) * jnp.tanh(c)
        return (h, c), None

    init = (jnp.zeros((B, H), jnp.float32), jnp.zeros((B, H), jnp.float32))
    (hT, cT), _ = lax.scan(step, init, x_tbc)

    def rmsnorm(v, g):  # F.normalize(dim=feature) * g * sqrt(H)
        nrm = jnp.sqrt(jnp.sum(v * v, axis=-1, keepdims=True))
        return v / jnp.maximum(nrm, 1e-12) * math.sqrt(H) * g[0, :, 0]

    ht = rmsnorm(hT, params["g_h"]) * (scale + 1.0) + shift
    ct = rmsnorm(cT, params["g_c"]) * (scale + 1.0) + shift
    return ht[None], ct[None]


# ----------------------------------------------------------------------------
if __name__ == "__main__":
    B, C_in, T = 2, 4, 8
    H = 32            # output_channels  (4H = 128 = one vreg lane width)
    time_dim = 16

    key = jax.random.PRNGKey(0)
    ks = jax.random.split(key, 10)
    k_rnn = 1.0 / math.sqrt(H)
    k_tm = 1.0 / math.sqrt(time_dim)

    params = {
        # PyTorch-layout LSTM weights: rows are gate blocks [i, f, g, o]
        "w_ih": jax.random.uniform(ks[0], (4 * H, C_in), jnp.float32, -k_rnn, k_rnn),
        "w_hh": jax.random.uniform(ks[1], (4 * H, H), jnp.float32, -k_rnn, k_rnn),
        "b_ih": jax.random.uniform(ks[2], (4 * H,), jnp.float32, -k_rnn, k_rnn),
        "b_hh": jax.random.uniform(ks[3], (4 * H,), jnp.float32, -k_rnn, k_rnn),
        # time_mlp Linear(time_dim, 2H), PyTorch layout (out, in)
        "w_tm": jax.random.uniform(ks[4], (2 * H, time_dim), jnp.float32, -k_tm, k_tm),
        "b_tm": jax.random.uniform(ks[5], (2 * H,), jnp.float32, -k_tm, k_tm),
        # RMSNorm weights, PyTorch shape (1, H, 1); perturbed from ones so the
        # correctness check actually exercises the per-feature scaling.
        "g_h": 1.0 + 0.1 * jax.random.normal(ks[6], (1, H, 1), jnp.float32),
        "g_c": 1.0 + 0.1 * jax.random.normal(ks[7], (1, H, 1), jnp.float32),
    }

    x = jax.random.normal(ks[8], (B, C_in, T), jnp.float32)
    t_emb = jax.random.normal(ks[9], (B, time_dim), jnp.float32)

    ht, ct = jax.block_until_ready(encoder_rnn_block_forward(x, t_emb, params))
    ht_ref, ct_ref = jax.block_until_ready(encoder_rnn_block_ref(x, t_emb, params))

    assert ht.shape == (1, B, H) and ct.shape == (1, B, H), (ht.shape, ct.shape)
    err = max(float(jnp.max(jnp.abs(ht - ht_ref))),
              float(jnp.max(jnp.abs(ct - ct_ref))))
    assert err < 2e-3, err
    print("KERNEL_OK")
</pallas_src>

<mosaic_0001>
module attributes {stable_mosaic.version = 11 : i64} {
  func.func @encoder_rnn_block_kernel(%arg0: memref<16x4xf32, #tpu.memory_space<vmem>>, %arg1: memref<4x128xf32, #tpu.memory_space<vmem>>, %arg2: memref<32x128xf32, #tpu.memory_space<vmem>>, %arg3: memref<1x128xf32, #tpu.memory_space<vmem>>, %arg4: memref<2x16xf32, #tpu.memory_space<vmem>>, %arg5: memref<16x64xf32, #tpu.memory_space<vmem>>, %arg6: memref<1x64xf32, #tpu.memory_space<vmem>>, %arg7: memref<1x32xf32, #tpu.memory_space<vmem>>, %arg8: memref<1x32xf32, #tpu.memory_space<vmem>>, %arg9: memref<2x32xf32, #tpu.memory_space<vmem>>, %arg10: memref<2x32xf32, #tpu.memory_space<vmem>>) attributes {dimension_semantics = [], scalar_prefetch = 0 : i64, scratch_operands = 0 : i64, tpu.core_type = #tpu.core_type<tc>} {
    %c0 = arith.constant 0 : index
    %c0_0 = arith.constant 0 : index
    %0 = vector.load %arg4[%c0, %c0_0] : memref<2x16xf32, #tpu.memory_space<vmem>>, vector<2x16xf32>
    %cst = arith.constant 5.000000e-01 : f32
    %1 = vector.broadcast %cst : f32 to vector<2x16xf32>
    %2 = arith.mulf %1, %0 : vector<2x16xf32>
    %3 = math.tanh %2 : vector<2x16xf32>
    %cst_1 = arith.constant 5.000000e-01 : f32
    %4 = vector.broadcast %cst_1 : f32 to vector<2x16xf32>
    %5 = arith.mulf %4, %3 : vector<2x16xf32>
    %cst_2 = arith.constant 5.000000e-01 : f32
    %6 = vector.broadcast %cst_2 : f32 to vector<2x16xf32>
    %7 = arith.addf %5, %6 : vector<2x16xf32>
    %8 = arith.mulf %0, %7 : vector<2x16xf32>
    %c0_3 = arith.constant 0 : index
    %c0_4 = arith.constant 0 : index
    %9 = vector.load %arg5[%c0_3, %c0_4] : memref<16x64xf32, #tpu.memory_space<vmem>>, vector<16x64xf32>
    %cst_5 = arith.constant dense<0.000000e+00> : vector<2x64xf32>
    %10 = tpu.matmul %8, %9, %cst_5 {dimension_numbers = #tpu.dot_dimension_numbers<[1], [0], [0], [1], [0, 0, 1, 1], [], []>} : vector<2x16xf32>, vector<16x64xf32>, vector<2x64xf32> -> vector<2x64xf32>
    %c0_6 = arith.constant 0 : index
    %c0_7 = arith.constant 0 : index
    %11 = vector.load %arg6[%c0_6, %c0_7] : memref<1x64xf32, #tpu.memory_space<vmem>>, vector<1x64xf32>
    %12 = vector.broadcast %11 : vector<1x64xf32> to vector<2x64xf32>
    %13 = arith.addf %10, %12 : vector<2x64xf32>
    %14 = vector.extract_strided_slice %13 {offsets = [0, 0], sizes = [2, 32], strides = [1, 1]} : vector<2x64xf32> to vector<2x32xf32>
    %cst_8 = arith.constant 1.000000e+00 : f32
    %15 = vector.broadcast %cst_8 : f32 to vector<2x32xf32>
    %16 = arith.addf %14, %15 : vector<2x32xf32>
    %17 = vector.extract_strided_slice %13 {offsets = [0, 32], sizes = [2, 32], strides = [1, 1]} : vector<2x64xf32> to vector<2x32xf32>
    %c0_9 = arith.constant 0 : index
    %c0_10 = arith.constant 0 : index
    %18 = vector.load %arg0[%c0_9, %c0_10] : memref<16x4xf32, #tpu.memory_space<vmem>>, vector<16x4xf32>
    %c0_11 = arith.constant 0 : index
    %c0_12 = arith.constant 0 : index
    %19 = vector.load %arg1[%c0_11, %c0_12] : memref<4x128xf32, #tpu.memory_space<vmem>>, vector<4x128xf32>
    %cst_13 = arith.constant dense<0.000000e+00> : vector<16x128xf32>
    %20 = tpu.matmul %18, %19, %cst_13 {dimension_numbers = #tpu.dot_dimension_numbers<[1], [0], [0], [1], [0, 0, 1, 1], [], []>} : vector<16x4xf32>, vector<4x128xf32>, vector<16x128xf32> -> vector<16x128xf32>
    %c0_14 = arith.constant 0 : index
    %c0_15 = arith.constant 0 : index
    %21 = vector.load %arg3[%c0_14, %c0_15] : memref<1x128xf32, #tpu.memory_space<vmem>>, vector<1x128xf32>
    %22 = vector.broadcast %21 : vector<1x128xf32> to vector<16x128xf32>
    %23 = arith.addf %20, %22 : vector<16x128xf32>
    %c0_16 = arith.constant 0 : index
    %c0_17 = arith.constant 0 : index
    %24 = vector.load %arg2[%c0_16, %c0_17] : memref<32x128xf32, #tpu.memory_space<vmem>>, vector<32x128xf32>
    %cst_18 = arith.constant 0.000000e+00 : f32
    %25 = vector.broadcast %cst_18 : f32 to vector<2x32xf32>
    %cst_19 = arith.constant 0.000000e+00 : f32
    %26 = vector.broadcast %cst_19 : f32 to vector<2x32xf32>
    %27 = vector.extract_strided_slice %23 {offsets = [0, 0], sizes = [2, 128], strides = [1, 1]} : vector<16x128xf32> to vector<2x128xf32>
    %cst_20 = arith.constant dense<0.000000e+00> : vector<2x128xf32>
    %28 = tpu.matmul %25, %24, %cst_20 {dimension_numbers = #tpu.dot_dimension_numbers<[1], [0], [0], [1], [0, 0, 1, 1], [], []>} : vector<2x32xf32>, vector<32x128xf32>, vector<2x128xf32> -> vector<2x128xf32>
    %29 = arith.addf %27, %28 : vector<2x128xf32>
    %30 = vector.extract_strided_slice %29 {offsets = [0, 0], sizes = [2, 96], strides = [1, 1]} : vector<2x128xf32> to vector<2x96xf32>
    %cst_21 = arith.constant 5.000000e-01 : f32
    %31 = vector.broadcast %cst_21 : f32 to vector<2x96xf32>
    %32 = arith.mulf %31, %30 : vector<2x96xf32>
    %33 = math.tanh %32 : vector<2x96xf32>
    %cst_22 = arith.constant 5.000000e-01 : f32
    %34 = vector.broadcast %cst_22 : f32 to vector<2x96xf32>
    %35 = arith.mulf %34, %33 : vector<2x96xf32>
    %cst_23 = arith.constant 5.000000e-01 : f32
    %36 = vector.broadcast %cst_23 : f32 to vector<2x96xf32>
    %37 = arith.addf %35, %36 : vector<2x96xf32>
    %38 = vector.extract_strided_slice %29 {offsets = [0, 96], sizes = [2, 32], strides = [1, 1]} : vector<2x128xf32> to vector<2x32xf32>
    %39 = math.tanh %38 : vector<2x32xf32>
    %40 = vector.extract_strided_slice %37 {offsets = [0, 0], sizes = [2, 32], strides = [1, 1]} : vector<2x96xf32> to vector<2x32xf32>
    %41 = vector.extract_strided_slice %37 {offsets = [0, 32], sizes = [2, 32], strides = [1, 1]} : vector<2x96xf32> to vector<2x32xf32>
    %42 = vector.extract_strided_slice %37 {offsets = [0, 64], sizes = [2, 32], strides = [1, 1]} : vector<2x96xf32> to vector<2x32xf32>
    %43 = arith.mulf %41, %26 : vector<2x32xf32>
    %44 = arith.mulf %40, %39 : vector<2x32xf32>
    %45 = arith.addf %43, %44 : vector<2x32xf32>
    %46 = math.tanh %45 : vector<2x32xf32>
    %47 = arith.mulf %42, %46 : vector<2x32xf32>
    %48 = vector.extract_strided_slice %23 {offsets = [2, 0], sizes = [2, 128], strides = [1, 1]} : vector<16x128xf32> to vector<2x128xf32>
    %cst_24 = arith.constant dense<0.000000e+00> : vector<2x128xf32>
    %49 = tpu.matmul %47, %24, %cst_24 {dimension_numbers = #tpu.dot_dimension_numbers<[1], [0], [0], [1], [0, 0, 1, 1], [], []>} : vector<2x32xf32>, vector<32x128xf32>, vector<2x128xf32> -> vector<2x128xf32>
    %50 = arith.addf %48, %49 : vector<2x128xf32>
    %51 = vector.extract_strided_slice %50 {offsets = [0, 0], sizes = [2, 96], strides = [1, 1]} : vector<2x128xf32> to vector<2x96xf32>
    %cst_25 = arith.constant 5.000000e-01 : f32
    %52 = vector.broadcast %cst_25 : f32 to vector<2x96xf32>
    %53 = arith.mulf %52, %51 : vector<2x96xf32>
    %54 = math.tanh %53 : vector<2x96xf32>
    %cst_26 = arith.constant 5.000000e-01 : f32
    %55 = vector.broadcast %cst_26 : f32 to vector<2x96xf32>
    %56 = arith.mulf %55, %54 : vector<2x96xf32>
    %cst_27 = arith.constant 5.000000e-01 : f32
    %57 = vector.broadcast %cst_27 : f32 to vector<2x96xf32>
    %58 = arith.addf %56, %57 : vector<2x96xf32>
    %59 = vector.extract_strided_slice %50 {offsets = [0, 96], sizes = [2, 32], strides = [1, 1]} : vector<2x128xf32> to vector<2x32xf32>
    %60 = math.tanh %59 : vector<2x32xf32>
    %61 = vector.extract_strided_slice %58 {offsets = [0, 0], sizes = [2, 32], strides = [1, 1]} : vector<2x96xf32> to vector<2x32xf32>
    %62 = vector.extract_strided_slice %58 {offsets = [0, 32], sizes = [2, 32], strides = [1, 1]} : vector<2x96xf32> to vector<2x32xf32>
    %63 = vector.extract_strided_slice %58 {offsets = [0, 64], sizes = [2, 32], strides = [1, 1]} : vector<2x96xf32> to vector<2x32xf32>
    %64 = arith.mulf %62, %45 : vector<2x32xf32>
    %65 = arith.mulf %61, %60 : vector<2x32xf32>
    %66 = arith.addf %64, %65 : vector<2x32xf32>
    %67 = math.tanh %66 : vector<2x32xf32>
    %68 = arith.mulf %63, %67 : vector<2x32xf32>
    %69 = vector.extract_strided_slice %23 {offsets = [4, 0], sizes = [2, 128], strides = [1, 1]} : vector<16x128xf32> to vector<2x128xf32>
    %cst_28 = arith.constant dense<0.000000e+00> : vector<2x128xf32>
    %70 = tpu.matmul %68, %24, %cst_28 {dimension_numbers = #tpu.dot_dimension_numbers<[1], [0], [0], [1], [0, 0, 1, 1], [], []>} : vector<2x32xf32>, vector<32x128xf32>, vector<2x128xf32> -> vector<2x128xf32>
    %71 = arith.addf %69, %70 : vector<2x128xf32>
    %72 = vector.extract_strided_slice %71 {offsets = [0, 0], sizes = [2, 96], strides = [1, 1]} : vector<2x128xf32> to vector<2x96xf32>
    %cst_29 = arith.constant 5.000000e-01 : f32
    %73 = vector.broadcast %cst_29 : f32 to vector<2x96xf32>
    %74 = arith.mulf %73, %72 : vector<2x96xf32>
    %75 = math.tanh %74 : vector<2x96xf32>
    %cst_30 = arith.constant 5.000000e-01 : f32
    %76 = vector.broadcast %cst_30 : f32 to vector<2x96xf32>
    %77 = arith.mulf %76, %75 : vector<2x96xf32>
    %cst_31 = arith.constant 5.000000e-01 : f32
    %78 = vector.broadcast %cst_31 : f32 to vector<2x96xf32>
    %79 = arith.addf %77, %78 : vector<2x96xf32>
    %80 = vector.extract_strided_slice %71 {offsets = [0, 96], sizes = [2, 32], strides = [1, 1]} : vector<2x128xf32> to vector<2x32xf32>
    %81 = math.tanh %80 : vector<2x32xf32>
    %82 = vector.extract_strided_slice %79 {offsets = [0, 0], sizes = [2, 32], strides = [1, 1]} : vector<2x96xf32> to vector<2x32xf32>
    %83 = vector.extract_strided_slice %79 {offsets = [0, 32], sizes = [2, 32], strides = [1, 1]} : vector<2x96xf32> to vector<2x32xf32>
    %84 = vector.extract_strided_slice %79 {offsets = [0, 64], sizes = [2, 32], strides = [1, 1]} : vector<2x96xf32> to vector<2x32xf32>
    %85 = arith.mulf %83, %66 : vector<2x32xf32>
    %86 = arith.mulf %82, %81 : vector<2x32xf32>
    %87 = arith.addf %85, %86 : vector<2x32xf32>
    %88 = math.tanh %87 : vector<2x32xf32>
    %89 = arith.mulf %84, %88 : vector<2x32xf32>
    %90 = vector.extract_strided_slice %23 {offsets = [6, 0], sizes = [2, 128], strides = [1, 1]} : vector<16x128xf32> to vector<2x128xf32>
    %cst_32 = arith.constant dense<0.000000e+00> : vector<2x128xf32>
    %91 = tpu.matmul %89, %24, %cst_32 {dimension_numbers = #tpu.dot_dimension_numbers<[1], [0], [0], [1], [0, 0, 1, 1], [], []>} : vector<2x32xf32>, vector<32x128xf32>, vector<2x128xf32> -> vector<2x128xf32>
    %92 = arith.addf %90, %91 : vector<2x128xf32>
    %93 = vector.extract_strided_slice %92 {offsets = [0, 0], sizes = [2, 96], strides = [1, 1]} : vector<2x128xf32> to vector<2x96xf32>
    %cst_33 = arith.constant 5.000000e-01 : f32
    %94 = vector.broadcast %cst_33 : f32 to vector<2x96xf32>
    %95 = arith.mulf %94, %93 : vector<2x96xf32>
    %96 = math.tanh %95 : vector<2x96xf32>
    %cst_34 = arith.constant 5.000000e-01 : f32
    %97 = vector.broadcast %cst_34 : f32 to vector<2x96xf32>
    %98 = arith.mulf %97, %96 : vector<2x96xf32>
    %cst_35 = arith.constant 5.000000e-01 : f32
    %99 = vector.broadcast %cst_35 : f32 to vector<2x96xf32>
    %100 = arith.addf %98, %99 : vector<2x96xf32>
    %101 = vector.extract_strided_slice %92 {offsets = [0, 96], sizes = [2, 32], strides = [1, 1]} : vector<2x128xf32> to vector<2x32xf32>
    %102 = math.tanh %101 : vector<2x32xf32>
    %103 = vector.extract_strided_slice %100 {offsets = [0, 0], sizes = [2, 32], strides = [1, 1]} : vector<2x96xf32> to vector<2x32xf32>
    %104 = vector.extract_strided_slice %100 {offsets = [0, 32], sizes = [2, 32], strides = [1, 1]} : vector<2x96xf32> to vector<2x32xf32>
    %105 = vector.extract_strided_slice %100 {offsets = [0, 64], sizes = [2, 32], strides = [1, 1]} : vector<2x96xf32> to vector<2x32xf32>
    %106 = arith.mulf %104, %87 : vector<2x32xf32>
    %107 = arith.mulf %103, %102 : vector<2x32xf32>
    %108 = arith.addf %106, %107 : vector<2x32xf32>
    %109 = math.tanh %108 : vector<2x32xf32>
    %110 = arith.mulf %105, %109 : vector<2x32xf32>
    %111 = vector.extract_strided_slice %23 {offsets = [8, 0], sizes = [2, 128], strides = [1, 1]} : vector<16x128xf32> to vector<2x128xf32>
    %cst_36 = arith.constant dense<0.000000e+00> : vector<2x128xf32>
    %112 = tpu.matmul %110, %24, %cst_36 {dimension_numbers = #tpu.dot_dimension_numbers<[1], [0], [0], [1], [0, 0, 1, 1], [], []>} : vector<2x32xf32>, vector<32x128xf32>, vector<2x128xf32> -> vector<2x128xf32>
    %113 = arith.addf %111, %112 : vector<2x128xf32>
    %114 = vector.extract_strided_slice %113 {offsets = [0, 0], sizes = [2, 96], strides = [1, 1]} : vector<2x128xf32> to vector<2x96xf32>
    %cst_37 = arith.constant 5.000000e-01 : f32
    %115 = vector.broadcast %cst_37 : f32 to vector<2x96xf32>
    %116 = arith.mulf %115, %114 : vector<2x96xf32>
    %117 = math.tanh %116 : vector<2x96xf32>
    %cst_38 = arith.constant 5.000000e-01 : f32
    %118 = vector.broadcast %cst_38 : f32 to vector<2x96xf32>
    %119 = arith.mulf %118, %117 : vector<2x96xf32>
    %cst_39 = arith.constant 5.000000e-01 : f32
    %120 = vector.broadcast %cst_39 : f32 to vector<2x96xf32>
    %121 = arith.addf %119, %120 : vector<2x96xf32>
    %122 = vector.extract_strided_slice %113 {offsets = [0, 96], sizes = [2, 32], strides = [1, 1]} : vector<2x128xf32> to vector<2x32xf32>
    %123 = math.tanh %122 : vector<2x32xf32>
    %124 = vector.extract_strided_slice %121 {offsets = [0, 0], sizes = [2, 32], strides = [1, 1]} : vector<2x96xf32> to vector<2x32xf32>
    %125 = vector.extract_strided_slice %121 {offsets = [0, 32], sizes = [2, 32], strides = [1, 1]} : vector<2x96xf32> to vector<2x32xf32>
    %126 = vector.extract_strided_slice %121 {offsets = [0, 64], sizes = [2, 32], strides = [1, 1]} : vector<2x96xf32> to vector<2x32xf32>
    %127 = arith.mulf %125, %108 : vector<2x32xf32>
    %128 = arith.mulf %124, %123 : vector<2x32xf32>
    %129 = arith.addf %127, %128 : vector<2x32xf32>
    %130 = math.tanh %129 : vector<2x32xf32>
    %131 = arith.mulf %126, %130 : vector<2x32xf32>
    %132 = vector.extract_strided_slice %23 {offsets = [10, 0], sizes = [2, 128], strides = [1, 1]} : vector<16x128xf32> to vector<2x128xf32>
    %cst_40 = arith.constant dense<0.000000e+00> : vector<2x128xf32>
    %133 = tpu.matmul %131, %24, %cst_40 {dimension_numbers = #tpu.dot_dimension_numbers<[1], [0], [0], [1], [0, 0, 1, 1], [], []>} : vector<2x32xf32>, vector<32x128xf32>, vector<2x128xf32> -> vector<2x128xf32>
    %134 = arith.addf %132, %133 : vector<2x128xf32>
    %135 = vector.extract_strided_slice %134 {offsets = [0, 0], sizes = [2, 96], strides = [1, 1]} : vector<2x128xf32> to vector<2x96xf32>
    %cst_41 = arith.constant 5.000000e-01 : f32
    %136 = vector.broadcast %cst_41 : f32 to vector<2x96xf32>
    %137 = arith.mulf %136, %135 : vector<2x96xf32>
    %138 = math.tanh %137 : vector<2x96xf32>
    %cst_42 = arith.constant 5.000000e-01 : f32
    %139 = vector.broadcast %cst_42 : f32 to vector<2x96xf32>
    %140 = arith.mulf %139, %138 : vector<2x96xf32>
    %cst_43 = arith.constant 5.000000e-01 : f32
    %141 = vector.broadcast %cst_43 : f32 to vector<2x96xf32>
    %142 = arith.addf %140, %141 : vector<2x96xf32>
    %143 = vector.extract_strided_slice %134 {offsets = [0, 96], sizes = [2, 32], strides = [1, 1]} : vector<2x128xf32> to vector<2x32xf32>
    %144 = math.tanh %143 : vector<2x32xf32>
    %145 = vector.extract_strided_slice %142 {offsets = [0, 0], sizes = [2, 32], strides = [1, 1]} : vector<2x96xf32> to vector<2x32xf32>
    %146 = vector.extract_strided_slice %142 {offsets = [0, 32], sizes = [2, 32], strides = [1, 1]} : vector<2x96xf32> to vector<2x32xf32>
    %147 = vector.extract_strided_slice %142 {offsets = [0, 64], sizes = [2, 32], strides = [1, 1]} : vector<2x96xf32> to vector<2x32xf32>
    %148 = arith.mulf %146, %129 : vector<2x32xf32>
    %149 = arith.mulf %145, %144 : vector<2x32xf32>
    %150 = arith.addf %148, %149 : vector<2x32xf32>
    %151 = math.tanh %150 : vector<2x32xf32>
    %152 = arith.mulf %147, %151 : vector<2x32xf32>
    %153 = vector.extract_strided_slice %23 {offsets = [12, 0], sizes = [2, 128], strides = [1, 1]} : vector<16x128xf32> to vector<2x128xf32>
    %cst_44 = arith.constant dense<0.000000e+00> : vector<2x128xf32>
    %154 = tpu.matmul %152, %24, %cst_44 {dimension_numbers = #tpu.dot_dimension_numbers<[1], [0], [0], [1], [0, 0, 1, 1], [], []>} : vector<2x32xf32>, vector<32x128xf32>, vector<2x128xf32> -> vector<2x128xf32>
    %155 = arith.addf %153, %154 : vector<2x128xf32>
    %156 = vector.extract_strided_slice %155 {offsets = [0, 0], sizes = [2, 96], strides = [1, 1]} : vector<2x128xf32> to vector<2x96xf32>
    %cst_45 = arith.constant 5.000000e-01 : f32
    %157 = vector.broadcast %cst_45 : f32 to vector<2x96xf32>
    %158 = arith.mulf %157, %156 : vector<2x96xf32>
    %159 = math.tanh %158 : vector<2x96xf32>
    %cst_46 = arith.constant 5.000000e-01 : f32
    %160 = vector.broadcast %cst_46 : f32 to vector<2x96xf32>
    %161 = arith.mulf %160, %159 : vector<2x96xf32>
    %cst_47 = arith.constant 5.000000e-01 : f32
    %162 = vector.broadcast %cst_47 : f32 to vector<2x96xf32>
    %163 = arith.addf %161, %162 : vector<2x96xf32>
    %164 = vector.extract_strided_slice %155 {offsets = [0, 96], sizes = [2, 32], strides = [1, 1]} : vector<2x128xf32> to vector<2x32xf32>
    %165 = math.tanh %164 : vector<2x32xf32>
    %166 = vector.extract_strided_slice %163 {offsets = [0, 0], sizes = [2, 32], strides = [1, 1]} : vector<2x96xf32> to vector<2x32xf32>
    %167 = vector.extract_strided_slice %163 {offsets = [0, 32], sizes = [2, 32], strides = [1, 1]} : vector<2x96xf32> to vector<2x32xf32>
    %168 = vector.extract_strided_slice %163 {offsets = [0, 64], sizes = [2, 32], strides = [1, 1]} : vector<2x96xf32> to vector<2x32xf32>
    %169 = arith.mulf %167, %150 : vector<2x32xf32>
    %170 = arith.mulf %166, %165 : vector<2x32xf32>
    %171 = arith.addf %169, %170 : vector<2x32xf32>
    %172 = math.tanh %171 : vector<2x32xf32>
    %173 = arith.mulf %168, %172 : vector<2x32xf32>
    %174 = vector.extract_strided_slice %23 {offsets = [14, 0], sizes = [2, 128], strides = [1, 1]} : vector<16x128xf32> to vector<2x128xf32>
    %cst_48 = arith.constant dense<0.000000e+00> : vector<2x128xf32>
    %175 = tpu.matmul %173, %24, %cst_48 {dimension_numbers = #tpu.dot_dimension_numbers<[1], [0], [0], [1], [0, 0, 1, 1], [], []>} : vector<2x32xf32>, vector<32x128xf32>, vector<2x128xf32> -> vector<2x128xf32>
    %176 = arith.addf %174, %175 : vector<2x128xf32>
    %177 = vector.extract_strided_slice %176 {offsets = [0, 0], sizes = [2, 96], strides = [1, 1]} : vector<2x128xf32> to vector<2x96xf32>
    %cst_49 = arith.constant 5.000000e-01 : f32
    %178 = vector.broadcast %cst_49 : f32 to vector<2x96xf32>
    %179 = arith.mulf %178, %177 : vector<2x96xf32>
    %180 = math.tanh %179 : vector<2x96xf32>
    %cst_50 = arith.constant 5.000000e-01 : f32
    %181 = vector.broadcast %cst_50 : f32 to vector<2x96xf32>
    %182 = arith.mulf %181, %180 : vector<2x96xf32>
    %cst_51 = arith.constant 5.000000e-01 : f32
    %183 = vector.broadcast %cst_51 : f32 to vector<2x96xf32>
    %184 = arith.addf %182, %183 : vector<2x96xf32>
    %185 = vector.extract_strided_slice %176 {offsets = [0, 96], sizes = [2, 32], strides = [1, 1]} : vector<2x128xf32> to vector<2x32xf32>
    %186 = math.tanh %185 : vector<2x32xf32>
    %187 = vector.extract_strided_slice %184 {offsets = [0, 0], sizes = [2, 32], strides = [1, 1]} : vector<2x96xf32> to vector<2x32xf32>
    %188 = vector.extract_strided_slice %184 {offsets = [0, 32], sizes = [2, 32], strides = [1, 1]} : vector<2x96xf32> to vector<2x32xf32>
    %189 = vector.extract_strided_slice %184 {offsets = [0, 64], sizes = [2, 32], strides = [1, 1]} : vector<2x96xf32> to vector<2x32xf32>
    %190 = arith.mulf %188, %171 : vector<2x32xf32>
    %191 = arith.mulf %187, %186 : vector<2x32xf32>
    %192 = arith.addf %190, %191 : vector<2x32xf32>
    %193 = math.tanh %192 : vector<2x32xf32>
    %194 = arith.mulf %189, %193 : vector<2x32xf32>
    %c0_52 = arith.constant 0 : index
    %c0_53 = arith.constant 0 : index
    %195 = vector.load %arg7[%c0_52, %c0_53] : memref<1x32xf32, #tpu.memory_space<vmem>>, vector<1x32xf32>
    %196 = arith.mulf %194, %194 : vector<2x32xf32>
    %cst_54 = arith.constant dense<0.000000e+00> : vector<2xf32>
    %197 = vector.multi_reduction <add>, %196, %cst_54 [1] : vector<2x32xf32> to vector<2xf32>
    %198 = vector.shape_cast %197 : vector<2xf32> to vector<2x1xf32>
    %cst_55 = arith.constant 1.000000e-24 : f32
    %199 = vector.broadcast %cst_55 : f32 to vector<2x1xf32>
    %200 = arith.maximumf %198, %199 : vector<2x1xf32>
    %201 = math.rsqrt %200 : vector<2x1xf32>
    %cst_56 = arith.constant 5.65685415 : f32
    %202 = vector.broadcast %cst_56 : f32 to vector<1x32xf32>
    %203 = arith.mulf %202, %195 : vector<1x32xf32>
    %204 = vector.broadcast %201 : vector<2x1xf32> to vector<2x32xf32>
    %205 = vector.broadcast %203 : vector<1x32xf32> to vector<2x32xf32>
    %206 = arith.mulf %204, %205 : vector<2x32xf32>
    %207 = arith.mulf %206, %16 : vector<2x32xf32>
    %208 = arith.mulf %194, %207 : vector<2x32xf32>
    %209 = arith.addf %208, %17 : vector<2x32xf32>
    %c0_57 = arith.constant 0 : index
    %c0_58 = arith.constant 0 : index
    %210 = vector.load %arg9[%c0_57, %c0_58] : memref<2x32xf32, #tpu.memory_space<vmem>>, vector<2x32xf32>
    tpu.vector_store %arg9[%c0_57, %c0_58], %209 {strides = array<i32>} : memref<2x32xf32, #tpu.memory_space<vmem>>, vector<2x32xf32>,
    %c0_59 = arith.constant 0 : index
    %c0_60 = arith.constant 0 : index
    %211 = vector.load %arg8[%c0_59, %c0_60] : memref<1x32xf32, #tpu.memory_space<vmem>>, vector<1x32xf32>
    %212 = arith.mulf %192, %192 : vector<2x32xf32>
    %cst_61 = arith.constant dense<0.000000e+00> : vector<2xf32>
    %213 = vector.multi_reduction <add>, %212, %cst_61 [1] : vector<2x32xf32> to vector<2xf32>
    %214 = vector.shape_cast %213 : vector<2xf32> to vector<2x1xf32>
    %cst_62 = arith.constant 1.000000e-24 : f32
    %215 = vector.broadcast %cst_62 : f32 to vector<2x1xf32>
    %216 = arith.maximumf %214, %215 : vector<2x1xf32>
    %217 = math.rsqrt %216 : vector<2x1xf32>
    %cst_63 = arith.constant 5.65685415 : f32
    %218 = vector.broadcast %cst_63 : f32 to vector<1x32xf32>
    %219 = arith.mulf %218, %211 : vector<1x32xf32>
    %220 = vector.broadcast %217 : vector<2x1xf32> to vector<2x32xf32>
    %221 = vector.broadcast %219 : vector<1x32xf32> to vector<2x32xf32>
    %222 = arith.mulf %220, %221 : vector<2x32xf32>
    %223 = arith.mulf %222, %16 : vector<2x32xf32>
    %224 = arith.mulf %192, %223 : vector<2x32xf32>
    %225 = arith.addf %224, %17 : vector<2x32xf32>
    %c0_64 = arith.constant 0 : index
    %c0_65 = arith.constant 0 : index
    %226 = vector.load %arg10[%c0_64, %c0_65] : memref<2x32xf32, #tpu.memory_space<vmem>>, vector<2x32xf32>
    tpu.vector_store %arg10[%c0_64, %c0_65], %225 {strides = array<i32>} : memref<2x32xf32, #tpu.memory_space<vmem>>, vector<2x32xf32>,
    return
  }
}

</mosaic_0001>

<bundles_post_ra>
// kernel: encoder_rnn_block_forward.1
= control target key start
LH: loop header
LB: loop body
LE: loop exit
PB: predicated region body
PF: predicated region fallthrough
CT: control target
= control target key end

     0   :  { %16 = vsyncpa [#allocation3], 0  ;;  %vm143_vm0 = vcmask 1043456   ;;  %vm136_vm1 = vcmask 31744   ;;  %v1473_v8 = vmov 0.0|0.0   ;;  %s1722_s0 = inlined_call_operand.vmem [shape: f32[16,4], index: 0, kind: input, shape index: {}]   ;;  %s1723_s1 = inlined_call_operand.vmem [shape: f32[4,128], index: 1, kind: input, shape index: {}]   ;;  %s1724_s2 = inlined_call_operand.vmem [shape: f32[32,128], index: 2, kind: input, shape index: {}]   ;;  %s1725_s3 = inlined_call_operand.vmem [shape: f32[1,128], index: 3, kind: input, shape index: {}]   ;;  %s1726_s4 = inlined_call_operand.vmem [shape: f32[2,16], index: 4, kind: input, shape index: {}]   ;;  %s1727_s5 = inlined_call_operand.vmem [shape: f32[16,64], index: 5, kind: input, shape index: {}]   ;;  %s1728_s6 = inlined_call_operand.vmem [shape: f32[1,64], index: 6, kind: input, shape index: {}]   ;;  %s1729_s7 = inlined_call_operand.vmem [shape: f32[1,32], index: 7, kind: input, shape index: {}]   ;;  %s1730_s8 = inlined_call_operand.vmem [shape: f32[1,32], index: 8, kind: input, shape index: {}]   ;;  %s1731_s9 = inlined_call_operand.hbm [shape: f32[2,32], index: 9, kind: output, shape index: {0}]   ;;  %s1732_s10 = inlined_call_operand.hbm [shape: f32[2,32], index: 10, kind: output, shape index: {1}]  }
   0x1   :  { %v128_v0 = vld [vmem:[%s1723_s1] sm:$0xf]  ;;  %v127_v2 = vld [vmem:[%s1722_s0 + $0x8] sm:$0xff]  ;;  %v224_v5 = vld [vmem:[%s1724_s2 + $0x10] sm:$0xff]  ;;  %1312 = vmatprep.subr.bf16.mxu0 %v1473_v8 }
   0x2   :  { %v126_v1 = vld [vmem:[%s1722_s0] sm:$0xff]  ;;  %1219 = vmatprep.subr.msk.mxu1 %vm143_vm0, %v128_v0  ;;  %v223_v4 = vld [vmem:[%s1724_s2 + $0x8] sm:$0xff]  ;;  %v225_v7 = vld [vmem:[%s1724_s2 + $0x18] sm:$0xff] }
   0x3   :  { %1221 = vmatprep.mubr.msk.f32.mxu1 %vm136_vm1, %v126_v1  ;;  %v222_v3 = vld [vmem:[%s1724_s2] sm:$0xff]  ;;  %1220 = vmatpush3.msk.msra.mxu1 %vm143_vm0, %v128_v0 }
   0x4   :  { %v1554_v6 = vpack.c.bf16 %v223_v4, %v222_v3 }
   0x5   :  { %17 = vsyncpa [#allocation5], 0  ;;  %1222 = vmatmul.mubr.msk.f32.vlgmr.msra.gmra.mrb[0].mxu1 %vm136_vm1, %v127_v2  ;;  %1315 = vmatprep.subr.bf16.mxu1 %v1473_v8  ;;  %v1562_v9 = vpack.c.bf16 %v225_v7, %v224_v5  ;;  %vm1474_vm2 = vmmov 0   ;;  %v1475_v10 = vmov 0.0   ;;  %v1155_v11 = vld [vmem:[%s1725_s3] ss:$0 sm:$0xff] }
   0x6   :  { %1317 = vmatpush3.bf16.msra.mxu1 %v1554_v6  ;;  %1232 = vmatprep.mubr.msk.f32.mxu1 %vm1474_vm2, %v1475_v10  ;;  %s1476_s26 = smov 32   ;;  %v42_v29 = vld [vmem:[%s1727_s5] sm:$0xff]  ;;  %v43_v30 = vld [vmem:[%s1727_s5 + $0x8] sm:$0xff]  ;;  %vm51_vm3 = vcmask 130048   ;;  %vm226_vm4 = vcmask 261120   ;;  %s1478_s5 = smov 96  }
   0x7   :  { %1318 = vmatprep.subr.bf16.mxu1 %v1473_v8  ;;  %1216 = vmatprep.mubr.msk.f32.mxu0 %vm1474_vm2, %v1475_v10  ;;  %v36_v31 = vld [vmem:[%s1726_s4] sm:$0x3]  ;;  %v1313_v32 = vpack.c.bf16 %v43_v30, %v42_v29  ;;  %s1477_s4 = smov 64   ;;  %vm1059_vm5 = vcmask 261126   ;;  %s1479_s16 = smov [#allocation4]  }
   0x8   :  { %v37_v33 = vmul.f32 0.5, %v36_v31  ;;  %s1141_s17 = sshll.u32 %s1479_s16, 4  ;;  %s1142_s17 = int_to_ptr.vmem [resolvable:$true] %s1141_s17 }
   0x9   :  { %1314 = vmatpush3.bf16.msra.mxu0 %v1313_v32  ;;  %p1430_p1 = scmp.lt.s32.totalorder %s1142_s17, %s1142_s17 }
   0xa   :  { %1320 = vmatpush3.bf16.msra.mxu1 %v1562_v9  ;;  %1321 = vmatprep.subr.bf16.mxu0 %v1473_v8 }
   0xb   :  { %1327 = vmatprep.subr.bf16.mxu1 %v1473_v8 }
   0xd   :  { %1233 = vmatmul.mubr.f32.vlgmr.msra.gmra.mrb[2].mxu1 %v1475_v10 }
   0xe   :  { %1329 = vmatpush3.bf16.msra.mxu1 %v1554_v6  ;;  %1254 = vmatprep.mubr.msk.f32.mxu1 %vm1474_vm2, %v1475_v10 }
   0xf   :  { %1330 = vmatprep.subr.bf16.mxu1 %v1473_v8 }
  0x12   :  { %1332 = vmatpush3.bf16.msra.mxu1 %v1562_v9 }
  0x13   :  { %1339 = vmatprep.subr.bf16.mxu1 %v1473_v8 }
  0xd8   :  { %v1223_v12 = vpop.f32.mrb[0].mxu1 }
  0xd9   :  { %v1581_v13 = vadd.f32 %v1223_v12, %v1155_v11  ;;  %v213_v14 = vpop.f32.mrb[1].mxu1 }
  0xda   :  { %v1583_v15 = vadd.f32 %v1155_v11, %v213_v14 }
  0xe0   :  { %v296_v16 = vpop.f32.mrb[2].mxu1 }
  0xe1   :  { %v300_v17 = vadd.f32 %v296_v16, %v1583_v15  ;;  %v1234_v18 = vpop.f32.mrb[3].mxu1 }
  0xe3   :  { %1371 = vtanh.f32 %v300_v17  ;;  %v301_v20 = vmul.f32 0.5, %v300_v17 }
  0xe5   :  { %1373 = vtanh.f32 %v301_v20 }
  0xed   :  { %v1372_v19 = vpop.eup %1371 }
  0xee   :  { %308 = vrot.lane.b32.xlu0 %v1372_v19, %s1476_s26 }
  0xef   :  { %v1374_v21 = vpop.eup %1373 }
  0xf0   :  { %v303_v22 = vmul.f32 0.5, %v1374_v21 }
  0xf2   :  { %v304_v23 = vadd.f32 0.5, %v303_v22 }
  0xf4   :  { %v306_v26 = vmul.f32 0.0, %v304_v23 }
 0x160   :  { %v309_v24 = vpop.permute.xlu0 %308 }
 0x161   :  { %v311_v25 = vmul.f32 %v309_v24, %v304_v23 }
 0x163   :  { %313 = vrot.lane.b32.xlu0 %v311_v25, %s1476_s26 }
 0x1d5   :  { %v314_v27 = vpop.permute.xlu0 %313 }
 0x1d6   :  { %v316_v28 = vadd.f32 %v314_v27, %v306_v26 }
 0x1d8   :  { %1375 = vtanh.f32 %v316_v28  ;;  %v408_v55 = vrot.slane %v316_v28, 6 }
 0x1d9   :  { %1377 = vtanh.f32 %v37_v33 }
 0x1e2   :  { %v1376_v34 = vpop.eup %1375 }
 0x1e3   :  { %319 = vrot.lane.b32.xlu1 %v1376_v34, %s1476_s26  ;;  %v1378_v35 = vpop.eup %1377 }
 0x1e4   :  { %v39_v36 = vmul.f32 0.5, %v1378_v35 }
 0x1e6   :  { %v40_v37 = vadd.f32 0.5, %v39_v36 }
 0x1e8   :  { %v41_v38 = vmul.f32 %v40_v37, %v36_v31 }
 0x1ea   :  { %1217 = vmatmul.mubr.msk.f32.vlgmr.msra.gmra.mrb[0].mxu0 %vm51_vm3, %v41_v38 }
 0x1eb   :  { %1323 = vmatpush3.bf16.msra.mxu0 %v1554_v6  ;;  %1243 = vmatprep.mubr.msk.f32.mxu0 %vm1474_vm2, %v1475_v10 }
 0x1ec   :  { %1324 = vmatprep.subr.bf16.mxu0 %v1473_v8 }
 0x1ef   :  { %1326 = vmatpush3.bf16.msra.mxu0 %v1562_v9 }
 0x1f0   :  { %1333 = vmatprep.subr.bf16.mxu0 %v1473_v8 }
 0x255   :  { %v320_v39 = vpop.permute.xlu1 %319 }
 0x256   :  { %v322_v40 = vmul.f32 %v320_v39, %v304_v23 }
 0x258   :  { %324 = vrot.lane.b32.xlu1 %v322_v40, %s1477_s4 }
 0x2bd   :  { %v1606_v41 = vpop.f32.mrb[0].mxu0 }
 0x2be   :  { %v1218_v42 = vpop.f32.mrb[1].mxu0 }
 0x2ca   :  { %v325_v43 = vpop.permute.xlu1 %324 }
 0x2cb   :  { %1244 = vmatmul.mubr.msk.f32.vlgmr.msra.gmra.mrb[2].mxu0 %vm226_vm4, %v325_v43 }
 0x2cc   :  { %1335 = vmatpush3.bf16.msra.mxu0 %v1554_v6  ;;  %1265 = vmatprep.mubr.msk.f32.mxu0 %vm1474_vm2, %v1475_v10 }
 0x2cd   :  { %1336 = vmatprep.subr.bf16.mxu0 %v1473_v8 }
 0x2d0   :  { %1338 = vmatpush3.bf16.msra.mxu0 %v1562_v9 }
 0x2d1   :  { %1345 = vmatprep.subr.bf16.mxu0 %v1473_v8 }
 0x39e   :  { %v394_v44 = vpop.f32.mrb[2].mxu0 }
 0x39f   :  { %v399_v45 = vrot.slane %v394_v44, 6  ;;  %v1245_v46 = vpop.f32.mrb[3].mxu0 }
 0x3a1   :  { %v401_v47 = vadd.f32 %v399_v45, %v1583_v15 }
 0x3a3   :  { %1379 = vtanh.f32 %v401_v47  ;;  %v402_v49 = vmul.f32 0.5, %v401_v47 }
 0x3a5   :  { %1381 = vtanh.f32 %v402_v49 }
 0x3ad   :  { %v1380_v48 = vpop.eup %1379 }
 0x3ae   :  { %412 = vrot.lane.b32.xlu0 %v1380_v48, %s1476_s26 }
 0x3af   :  { %v1382_v50 = vpop.eup %1381 }
 0x3b0   :  { %v404_v51 = vmul.f32 0.5, %v1382_v50 }
 0x3b2   :  { %v405_v52 = vadd.f32 0.5, %v404_v51 }
 0x3b4   :  { %v410_v56 = vmul.f32 %v408_v55, %v405_v52 }
 0x420   :  { %v413_v53 = vpop.permute.xlu0 %412 }
 0x421   :  { %v415_v54 = vmul.f32 %v413_v53, %v405_v52 }
 0x423   :  { %417 = vrot.lane.b32.xlu1 %v415_v54, %s1476_s26 }
 0x495   :  { %v418_v57 = vpop.permute.xlu1 %417 }
 0x496   :  { %v420_v58 = vadd.f32 %v418_v57, %v410_v56 }
 0x498   :  { %1383 = vtanh.f32 %v420_v58  ;;  %v513_v17 = vrot.slane %v420_v58, 6 }
 0x4a2   :  { %v1384_v59 = vpop.eup %1383 }
 0x4a3   :  { %423 = vrot.lane.b32.xlu0 %v1384_v59, %s1476_s26 }
 0x515   :  { %v424_v60 = vpop.permute.xlu0 %423 }
 0x516   :  { %v426_v61 = vmul.f32 %v424_v60, %v405_v52 }
 0x518   :  { %v428_v62 = vrot.slane %v426_v61, 2 }
 0x51a   :  { %429 = vrot.lane.b32.xlu1 %v428_v62, %s1477_s4 }
 0x58c   :  { %v430_v63 = vpop.permute.xlu1 %429 }
 0x58d   :  { %1255 = vmatmul.mubr.msk.f32.vlgmr.msra.gmra.mrb[4].mxu1 %vm226_vm4, %v430_v63 }
 0x58e   :  { %1341 = vmatpush3.bf16.msra.mxu1 %v1554_v6  ;;  %1276 = vmatprep.mubr.msk.f32.mxu1 %vm1474_vm2, %v1475_v10 }
 0x58f   :  { %1342 = vmatprep.subr.bf16.mxu1 %v1473_v8 }
 0x592   :  { %1344 = vmatpush3.bf16.msra.mxu1 %v1562_v9 }
 0x593   :  { %1351 = vmatprep.subr.bf16.mxu1 %v1473_v8 }
 0x660   :  { %v499_v0 = vpop.f32.mrb[4].mxu1 }
 0x661   :  { %v504_v1 = vrot.slane %v499_v0, 4  ;;  %v1256_v2 = vpop.f32.mrb[5].mxu1 }
 0x663   :  { %v506_v3 = vadd.f32 %v504_v1, %v1583_v15 }
 0x665   :  { %1385 = vtanh.f32 %v506_v3  ;;  %v507_v5 = vmul.f32 0.5, %v506_v3 }
 0x667   :  { %1387 = vtanh.f32 %v507_v5 }
 0x66f   :  { %v1386_v4 = vpop.eup %1385 }
 0x670   :  { %517 = vrot.lane.b32.xlu0 %v1386_v4, %s1476_s26 }
 0x671   :  { %v1388_v7 = vpop.eup %1387 }
 0x672   :  { %v509_v11 = vmul.f32 0.5, %v1388_v7 }
 0x674   :  { %v510_v12 = vadd.f32 0.5, %v509_v11 }
 0x676   :  { %v515_v18 = vmul.f32 %v513_v17, %v510_v12 }
 0x6e2   :  { %v518_v14 = vpop.permute.xlu0 %517 }
 0x6e3   :  { %v520_v16 = vmul.f32 %v518_v14, %v510_v12 }
 0x6e5   :  { %522 = vrot.lane.b32.xlu1 %v520_v16, %s1476_s26 }
 0x757   :  { %v523_v19 = vpop.permute.xlu1 %522 }
 0x758   :  { %v525_v20 = vadd.f32 %v523_v19, %v515_v18 }
 0x75a   :  { %1389 = vtanh.f32 %v525_v20  ;;  %v618_v37 = vrot.slane %v525_v20, 6 }
 0x764   :  { %v1390_v21 = vpop.eup %1389 }
 0x765   :  { %528 = vrot.lane.b32.xlu0 %v1390_v21, %s1476_s26 }
 0x7d7   :  { %v529_v22 = vpop.permute.xlu0 %528 }
 0x7d8   :  { %v531_v23 = vmul.f32 %v529_v22, %v510_v12 }
 0x7da   :  { %v533_v24 = vrot.slane %v531_v23, 4 }
 0x7dc   :  { %534 = vrot.lane.b32.xlu1 %v533_v24, %s1477_s4 }
 0x84e   :  { %v535_v25 = vpop.permute.xlu1 %534 }
 0x84f   :  { %1266 = vmatmul.mubr.msk.f32.vlgmr.msra.gmra.mrb[4].mxu0 %vm226_vm4, %v535_v25 }
 0x850   :  { %1347 = vmatpush3.bf16.msra.mxu0 %v1554_v6  ;;  %1287 = vmatprep.mubr.msk.f32.mxu0 %vm1474_vm2, %v1475_v10 }
 0x851   :  { %1348 = vmatprep.subr.bf16.mxu0 %v1473_v8 }
 0x854   :  { %1350 = vmatpush3.bf16.msra.mxu0 %v1562_v9 }
 0x855   :  { %1357 = vmatprep.subr.bf16.mxu0 %v1473_v8 }
 0x922   :  { %v604_v26 = vpop.f32.mrb[4].mxu0 }
 0x923   :  { %v609_v27 = vrot.slane %v604_v26, 2  ;;  %v1267_v28 = vpop.f32.mrb[5].mxu0 }
 0x925   :  { %v611_v29 = vadd.f32 %v609_v27, %v1583_v15 }
 0x927   :  { %1391 = vtanh.f32 %v611_v29  ;;  %v612_v31 = vmul.f32 0.5, %v611_v29 }
 0x929   :  { %1393 = vtanh.f32 %v612_v31 }
 0x931   :  { %v1392_v30 = vpop.eup %1391 }
 0x932   :  { %622 = vrot.lane.b32.xlu0 %v1392_v30, %s1476_s26 }
 0x933   :  { %v1394_v32 = vpop.eup %1393 }
 0x934   :  { %v614_v33 = vmul.f32 0.5, %v1394_v32 }
 0x936   :  { %v615_v34 = vadd.f32 0.5, %v614_v33 }
 0x938   :  { %v620_v38 = vmul.f32 %v618_v37, %v615_v34 }
 0x9a4   :  { %v623_v35 = vpop.permute.xlu0 %622 }
 0x9a5   :  { %v625_v36 = vmul.f32 %v623_v35, %v615_v34 }
 0x9a7   :  { %627 = vrot.lane.b32.xlu1 %v625_v36, %s1476_s26 }
 0xa19   :  { %v628_v39 = vpop.permute.xlu1 %627 }
 0xa1a   :  { %v630_v40 = vadd.f32 %v628_v39, %v620_v38 }
 0xa1c   :  { %1395 = vtanh.f32 %v630_v40  ;;  %v720_v56 = vrot.slane %v630_v40, 6 }
 0xa26   :  { %v1396_v42 = vpop.eup %1395 }
 0xa27   :  { %633 = vrot.lane.b32.xlu0 %v1396_v42, %s1476_s26 }
 0xa99   :  { %v634_v15 = vpop.permute.xlu0 %633 }
 0xa9a   :  { %v636_v43 = vmul.f32 %v634_v15, %v615_v34 }
 0xa9c   :  { %v638_v44 = vrot.slane %v636_v43, 6 }
 0xa9e   :  { %639 = vrot.lane.b32.xlu1 %v638_v44, %s1477_s4 }
 0xb10   :  { %v640_v45 = vpop.permute.xlu1 %639 }
 0xb11   :  { %1277 = vmatmul.mubr.msk.f32.vlgmr.msra.gmra.mrb[6].mxu1 %vm226_vm4, %v640_v45 }
 0xb12   :  { %1353 = vmatpush3.bf16.msra.mxu1 %v1554_v6  ;;  %1298 = vmatprep.mubr.msk.f32.mxu1 %vm1474_vm2, %v1475_v10 }
 0xb13   :  { %1354 = vmatprep.subr.bf16.mxu1 %v1473_v8 }
 0xb16   :  { %1356 = vmatpush3.bf16.msra.mxu1 %v1562_v9 }
 0xbe4   :  { %v709_v46 = vpop.f32.mrb[6].mxu1 }
 0xbe5   :  { %v713_v47 = vadd.f32 %v709_v46, %v1581_v13  ;;  %v1278_v48 = vpop.f32.mrb[7].mxu1 }
 0xbe7   :  { %1397 = vtanh.f32 %v713_v47  ;;  %v714_v50 = vmul.f32 0.5, %v713_v47 }
 0xbe9   :  { %1399 = vtanh.f32 %v714_v50 }
 0xbf1   :  { %v1398_v49 = vpop.eup %1397 }
 0xbf2   :  { %724 = vrot.lane.b32.xlu0 %v1398_v49, %s1476_s26 }
 0xbf3   :  { %v1400_v51 = vpop.eup %1399 }
 0xbf4   :  { %v716_v52 = vmul.f32 0.5, %v1400_v51 }
 0xbf6   :  { %v717_v53 = vadd.f32 0.5, %v716_v52 }
 0xbf8   :  { %v722_v57 = vmul.f32 %v720_v56, %v717_v53 }
 0xc64   :  { %v725_v54 = vpop.permute.xlu0 %724 }
 0xc65   :  { %v727_v55 = vmul.f32 %v725_v54, %v717_v53 }
 0xc67   :  { %729 = vrot.lane.b32.xlu1 %v727_v55, %s1476_s26 }
 0xcd9   :  { %v730_v58 = vpop.permute.xlu1 %729 }
 0xcda   :  { %v732_v59 = vadd.f32 %v730_v58, %v722_v57 }
 0xcdc   :  { %1401 = vtanh.f32 %v732_v59 }
 0xce6   :  { %v1402_v60 = vpop.eup %1401 }
 0xce7   :  { %735 = vrot.lane.b32.xlu0 %v1402_v60, %s1476_s26 }
 0xd59   :  { %v736_v61 = vpop.permute.xlu0 %735 }
 0xd5a   :  { %v738_v62 = vmul.f32 %v736_v61, %v717_v53 }
 0xd5c   :  { %740 = vrot.lane.b32.xlu1 %v738_v62, %s1477_s4 }
 0xdce   :  { %v741_v63 = vpop.permute.xlu1 %740 }
 0xdcf   :  { %1288 = vmatmul.mubr.msk.f32.vlgmr.msra.gmra.mrb[6].mxu0 %vm226_vm4, %v741_v63 }
 0xdd0   :  { %1359 = vmatpush3.bf16.msra.mxu0 %v1554_v6  ;;  %1309 = vmatprep.mubr.msk.f32.mxu0 %vm1474_vm2, %v1475_v10 }
 0xdd1   :  { %1360 = vmatprep.subr.bf16.mxu0 %v1473_v8  ;;  %v824_v8 = vrot.slane %v732_v59, 6 }
 0xdd4   :  { %1362 = vmatpush3.bf16.msra.mxu0 %v1562_v9 }
 0xea2   :  { %v810_v0 = vpop.f32.mrb[6].mxu0 }
 0xea3   :  { %v815_v1 = vrot.slane %v810_v0, 6  ;;  %v1289_v2 = vpop.f32.mrb[7].mxu0 }
 0xea5   :  { %v817_v3 = vadd.f32 %v815_v1, %v1581_v13  ;;  %v1067_v1 = vlaneseq }
 0xea7   :  { %1403 = vtanh.f32 %v817_v3  ;;  %v818_v5 = vmul.f32 0.5, %v817_v3 }
 0xea9   :  { %1405 = vtanh.f32 %v818_v5  ;;  %v1153_v5 = vld [vmem:[%s1728_s6] ss:$0 sm:$0xff] }
 0xeb1   :  { %v1404_v4 = vpop.eup %1403 }
 0xeb2   :  { %828 = vrot.lane.b32.xlu0 %v1404_v4, %s1476_s26  ;;  %v1068_v4 = vshrl.u32 %v1067_v1, 7 }
 0xeb3   :  { %v1406_v7 = vpop.eup %1405 }
 0xeb4   :  { %v820_v6 = vmul.f32 0.5, %v1406_v7  ;;  %v1093_v7 = vld [vmem:[%s1730_s8] sm:$0x1] }
 0xeb6   :  { %v821_v11 = vadd.f32 0.5, %v820_v6  ;;  %v122_v6 = vadd.f32 %v1153_v5, %v1606_v41  ;;  %v1053_v41 = vld [vmem:[%s1729_s7] sm:$0x1]  ;;  %s1425_s7 = scalar_lea.vmem %s1142_s17, 32 }
 0xeb7   :  { %p1426_p0 = scmp.ne.s32.totalorder %s1142_s17, %s1425_s7  ;;  %p1431_p2 = scmp.lt.s32.totalorder %s1425_s7, %s1425_s7 }
 0xeb8   :  { %v826_v9 = vmul.f32 %v824_v8, %v821_v11 }
 0xeb9   :  { %p1432_p3 = por %p1431_p2, %p1430_p1 }
 0xebb   :  { %p1433_p4 = pnand %p1432_p3, %p1426_p0 }
 0xf24   :  { %v829_v12 = vpop.permute.xlu0 %828 }
 0xf25   :  { %v831_v10 = vmul.f32 %v829_v12, %v821_v11  ;;  %v1104_v12 = vmul.f32 5.656854, %v1093_v7 }
 0xf27   :  { %833 = vrot.lane.b32.xlu1 %v831_v10, %s1476_s26  ;;  %v125_v10 = vadd.f32 1.0, %v122_v6 }
 0xf99   :  { %v834_v14 = vpop.permute.xlu1 %833 }
 0xf9a   :  { %v836_v16 = vadd.f32 %v834_v14, %v826_v9  ;;  %v1074_v14 = vrot.slane %v125_v10, 2 }
 0xf9c   :  { %1407 = vtanh.f32 %v836_v16  ;;  %v929_v33 = vrot.slane %v836_v16, 6 }
 0xfa6   :  { %v1408_v17 = vpop.eup %1407 }
 0xfa7   :  { %839 = vrot.lane.b32.xlu0 %v1408_v17, %s1476_s26 }
0x1019   :  { %v840_v18 = vpop.permute.xlu0 %839 }
0x101a   :  { %v842_v19 = vmul.f32 %v840_v18, %v821_v11  ;;  %v1069_v11 = vsub.s32 0, %v1068_v4  ;;  %v1083_v18 = vrot.slane %v122_v6, 2 }
0x101c   :  { %v844_v20 = vrot.slane %v842_v19, 2  ;;  %v1109_v8 = vrot.slane %v1104_v12, %v1069_v11 }
0x101e   :  { %845 = vrot.lane.b32.xlu1 %v844_v20, %s1477_s4 }
0x1090   :  { %v846_v21 = vpop.permute.xlu1 %845 }
0x1091   :  { %1299 = vmatmul.mubr.msk.f32.vlgmr.msra.gmra.mrb[8].mxu1 %vm226_vm4, %v846_v21  ;;  %v1065_v21 = vmul.f32 5.656854, %v1053_v41 }
0x1164   :  { %v915_v22 = vpop.f32.mrb[8].mxu1 }
0x1165   :  { %v920_v23 = vrot.slane %v915_v22, 4  ;;  %v1300_v24 = vpop.f32.mrb[9].mxu1  ;;  %v1070_v22 = vrot.slane %v1065_v21, %v1069_v11 }
0x1167   :  { %v922_v25 = vadd.f32 %v920_v23, %v1581_v13 }
0x1169   :  { %1409 = vtanh.f32 %v922_v25  ;;  %v923_v27 = vmul.f32 0.5, %v922_v25 }
0x116b   :  { %1411 = vtanh.f32 %v923_v27 }
0x1173   :  { %v1410_v26 = vpop.eup %1409 }
0x1174   :  { %933 = vrot.lane.b32.xlu0 %v1410_v26, %s1476_s26 }
0x1175   :  { %v1412_v28 = vpop.eup %1411 }
0x1176   :  { %v925_v29 = vmul.f32 0.5, %v1412_v28 }
0x1178   :  { %v926_v30 = vadd.f32 0.5, %v925_v29 }
0x117a   :  { %v931_v34 = vmul.f32 %v929_v33, %v926_v30 }
0x11e6   :  { %v934_v31 = vpop.permute.xlu0 %933 }
0x11e7   :  { %v936_v32 = vmul.f32 %v934_v31, %v926_v30 }
0x11e9   :  { %938 = vrot.lane.b32.xlu1 %v936_v32, %s1476_s26 }
0x125b   :  { %v939_v35 = vpop.permute.xlu1 %938 }
0x125c   :  { %v941_v36 = vadd.f32 %v939_v35, %v931_v34 }
0x125e   :  { %1413 = vtanh.f32 %v941_v36  ;;  %v1034_v53 = vrot.slane %v941_v36, 6 }
0x1268   :  { %v1414_v37 = vpop.eup %1413 }
0x1269   :  { %944 = vrot.lane.b32.xlu0 %v1414_v37, %s1476_s26 }
0x12db   :  { %v945_v38 = vpop.permute.xlu0 %944 }
0x12dc   :  { %v947_v39 = vmul.f32 %v945_v38, %v926_v30 }
0x12de   :  { %v949_v40 = vrot.slane %v947_v39, 4 }
0x12e0   :  { %950 = vrot.lane.b32.xlu1 %v949_v40, %s1477_s4 }
0x1352   :  { %v951_v42 = vpop.permute.xlu1 %950 }
0x1353   :  { %1310 = vmatmul.mubr.msk.f32.vlgmr.msra.gmra.mrb[8].mxu0 %vm226_vm4, %v951_v42 }
0x1426   :  { %v1020_v15 = vpop.f32.mrb[8].mxu0 }
0x1427   :  { %v1025_v43 = vrot.slane %v1020_v15, 2  ;;  %v1311_v44 = vpop.f32.mrb[9].mxu0 }
0x1429   :  { %v1027_v45 = vadd.f32 %v1025_v43, %v1581_v13 }
0x142b   :  { %1415 = vtanh.f32 %v1027_v45  ;;  %v1028_v47 = vmul.f32 0.5, %v1027_v45 }
0x142d   :  { %1417 = vtanh.f32 %v1028_v47 }
0x1435   :  { %v1416_v46 = vpop.eup %1415 }
0x1436   :  { %1038 = vrot.lane.b32.xlu0 %v1416_v46, %s1476_s26 }
0x1437   :  { %v1418_v48 = vpop.eup %1417 }
0x1438   :  { %v1030_v49 = vmul.f32 0.5, %v1418_v48 }
0x143a   :  { %v1031_v50 = vadd.f32 0.5, %v1030_v49 }
0x143c   :  { %v1036_v54 = vmul.f32 %v1034_v53, %v1031_v50 }
0x14a8   :  { %v1039_v51 = vpop.permute.xlu0 %1038 }
0x14a9   :  { %v1041_v52 = vmul.f32 %v1039_v51, %v1031_v50 }
0x14ab   :  { %1043 = vrot.lane.b32.xlu1 %v1041_v52, %s1476_s26 }
0x151d   :  { %v1044_v55 = vpop.permute.xlu1 %1043 }
0x151e   :  { %v1046_v56 = vadd.f32 %v1044_v55, %v1036_v54 }
0x1520   :  { %1419 = vtanh.f32 %v1046_v56  ;;  %v1094_v13 = vmul.f32 %v1046_v56, %v1046_v56 }
0x152a   :  { %v1420_v57 = vpop.eup %1419 }
0x152b   :  { %1049 = vrot.lane.b32.xlu0 %v1420_v57, %s1476_s26 }
0x152f   :  { %1096 = vrot.lane.b32.xlu0 %v1094_v13, %s1478_s5 }
0x159d   :  { %v1050_v58 = vpop.permute.xlu0 %1049 }
0x159e   :  { %v1052_v59 = vmul.f32 %v1050_v58, %v1031_v50 }
0x15a0   :  { %v1054_v60 = vmul.f32 %v1052_v59, %v1052_v59 }
0x15a1   :  { %v1097_v61 = vpop.permute.xlu0 %1096 }
0x15a2   :  { %1056 = vrot.lane.b32.xlu1 %v1054_v60, %s1477_s4  ;;  %v1099_v62 = vsel %vm1059_vm5, %v1097_v61, 0.0 }
0x15a3   :  { %1100 = vadd.xlane.f32.xlu0 %v1099_v62 }
0x1614   :  { %v1057_v63 = vpop.permute.xlu1 %1056 }
0x1615   :  { %v1060_v0 = vsel %vm1059_vm5, %v1057_v63, 0.0 }
0x1616   :  { %1061 = vadd.xlane.f32.xlu1 %v1060_v0 }
0x1630   :  { %v1101_v2 = vpop.xlane.xlu0 %1100 }
0x1631   :  { %v1102_v3 = vmax.f32 %v1101_v2, 1e-24 }
0x1633   :  { %1421 = vrsqrt.f32 %v1102_v3 }
0x163d   :  { %v1422_v9 = vpop.eup %1421 }
0x163e   :  { %v1111_v16 = vmul.f32 %v1422_v9, %v1109_v8 }
0x1640   :  { %v1112_v17 = vmul.f32 %v1111_v16, %v1074_v14 }
0x1642   :  { %1114 = vrot.lane.b32.xlu1 %v1112_v17, %s1476_s26 }
0x1646   :  { %1084 = vrot.lane.b32.xlu1 %v1083_v18, %s1476_s26 }
0x16a3   :  { %v1062_v19 = vpop.xlane.xlu1 %1061 }
0x16a4   :  { %v1063_v20 = vmax.f32 %v1062_v19, 1e-24 }
0x16a6   :  { %1423 = vrsqrt.f32 %v1063_v20 }
0x16b0   :  { %v1424_v23 = vpop.eup %1423 }
0x16b1   :  { %v1072_v24 = vmul.f32 %v1424_v23, %v1070_v22 }
0x16b3   :  { %v1076_v25 = vmul.f32 %v1074_v14, %v1072_v24 }
0x16b4   :  { %v1115_v26 = vpop.permute.xlu1 %1114 }
0x16b5   :  { %v1117_v27 = vmul.f32 %v1115_v26, %v1046_v56  ;;  %1078 = vrot.lane.b32.xlu0 %v1076_v25, %s1477_s4 }
0x16b7   :  { %v1119_v28 = vadd.f32 %v1117_v27, %v1083_v18 }
0x16b8   :  { %v1085_v29 = vpop.permute.xlu1 %1084 }
0x16b9   :  { %1121 = vrot.lane.b32.xlu1 %v1119_v28, %s1478_s5 }
0x1727   :  { %v1079_v30 = vpop.permute.xlu0 %1078 }
0x1728   :  { %v1081_v31 = vmul.f32 %v1079_v30, %v1052_v59 }
0x172a   :  { %v1087_v32 = vadd.f32 %v1085_v29, %v1081_v31 }
0x172b   :  { %v1122_v33 = vpop.permute.xlu1 %1121 }
0x172c   :  { %1124 = vst.msk [vmem:[#allocation4 - $0x6] sm:$0xc0] %vm1059_vm5, %v1122_v33  ;;  %1089 = vrot.lane.b32.xlu0 %v1087_v32, %s1477_s4 }
0x172d   :  { %1436 = shalt.err (!%p1433_p4)
}
0x172e   :  { %s1437_s20 = scalar_lea.hbm %s1732_s10, 32 }
0x172f   :  { %p1438_p5 = scmp.ne.s32.totalorder %s1732_s10, %s1437_s20  ;;  %p1441_p6 = scmp.lt.u32.totalorder %s1437_s20, %s1732_s10 }
0x1731   :  { %p1443_p7 = pnand %p1441_p6, %p1438_p5 }
0x1733   :  { %1446 = shalt.err (!%p1443_p7)
}
0x1734   :  { %1144 = dma.vmem_to_hbm [thread:$0]  %s1142_s17, 32, %s1732_s10, [#allocation5]  }
0x1735   :  { %s1480_s0 = smov [#allocation2]  }
0x1736   :  { %s1131_s2 = sshll.u32 %s1480_s0, 4  ;;  %s1132_s2 = int_to_ptr.vmem [resolvable:$true] %s1131_s2 }
0x1737   :  { %s1447_s26 = scalar_lea.vmem %s1132_s2, 32  ;;  %p1452_p9 = scmp.lt.s32.totalorder %s1132_s2, %s1132_s2 }
0x1738   :  { %p1448_p8 = scmp.ne.s32.totalorder %s1132_s2, %s1447_s26  ;;  %p1453_p10 = scmp.lt.s32.totalorder %s1447_s26, %s1447_s26 }
0x173a   :  { %p1454_p11 = por %p1453_p10, %p1452_p9 }
0x173c   :  { %p1455_p12 = pnand %p1454_p11, %p1448_p8 }
0x179e   :  { %v1090_v34 = vpop.permute.xlu0 %1089 }
0x179f   :  { %1092 = vst.msk [vmem:[#allocation2 - $0x6] sm:$0xc0] %vm1059_vm5, %v1090_v34 }
0x17a0   :  { %1458 = shalt.err (!%p1455_p12)
}
0x17a1   :  { %s1459_s28 = scalar_lea.hbm %s1731_s9, 32 }
0x17a2   :  { %p1460_p13 = scmp.ne.s32.totalorder %s1731_s9, %s1459_s28  ;;  %p1463_p0 = scmp.lt.u32.totalorder %s1459_s28, %s1731_s9 }
0x17a4   :  { %p1465_p1 = pnand %p1463_p0, %p1460_p13 }
0x17a6   :  { %1468 = shalt.err (!%p1465_p1)
}
0x17a7   :  { %1134 = dma.vmem_to_hbm [thread:$0]  %s1132_s2, 32, %s1731_s9, [#allocation3]  }
0x17a8   :  { %1469 = dma.done.wait [#allocation3], 32  }
0x17a9   :  { %1470 = vsyncadd [#allocation3], 4294967264 }
0x17aa   :  { %1471 = dma.done.wait [#allocation5], 32  }
0x17ab   :  { %1472 = vsyncadd [#allocation5], 4294967264 }
0x17ac   :  { %1151 = vsyncpa [#allocation3], 1 }
0x17ad   :  { %1152 = vsyncpa [#allocation5], 1 }

</bundles_post_ra>
